<compile_context>
chip_gen: v7x
topology: tpu7x:2x2x1
jax: 0.10.0
libtpu: 0.0.40
codegen_flags: <defaults>
</compile_context>

<pallas_src>
import functools

import jax
import jax.numpy as jnp
from jax.experimental import pallas as pl
from jax.experimental.pallas import tpu as pltpu


def _round_up(x, m):
    return ((x + m - 1) // m) * m


def _choose_batch_tile(B, block_b, min_grid_steps):
    """Large batch tile (multiple of 8), but keep >= min_grid_steps grid steps."""
    if B <= 8:
        return B  # full-dim block (always legal)
    tb = min(block_b, _round_up(B, 8))
    if min_grid_steps > 1 and pl.cdiv(B, tb) < min_grid_steps and B >= 8 * min_grid_steps:
        tb = _round_up(pl.cdiv(B, min_grid_steps), 8)
    return tb


def _resident_spec(shape):
    """Full-array block, constant index_map, single-buffered (resident weights)."""
    nd = len(shape)
    return pl.BlockSpec(shape, lambda i: (0,) * nd, pipeline_mode=pl.Buffered(1))


def _mlp_resnet_kernel(x_ref, w1_ref, b1_ref, w2_ref, b2_ref, w3_ref, b3_ref,
                       out_ref, *maybe_res_ref, n_blocks, compute_dtype, emit_res):
    res_ref = maybe_res_ref[0] if emit_res else None

    x = x_ref[...].astype(jnp.float32)          # running activation, f32
    for j in range(n_blocks):                   # static unroll; n_blocks is small
        # Layer 1: Linear + ReLU  (MXU in compute_dtype, f32 accumulation)
        h = jnp.dot(x.astype(compute_dtype), w1_ref[j],
                    preferred_element_type=jnp.float32) + b1_ref[j]
        h = jnp.maximum(h, 0.0)
        # Layer 2: Linear + ReLU
        h = jnp.dot(h.astype(compute_dtype), w2_ref[j],
                    preferred_element_type=jnp.float32) + b2_ref[j]
        h = jnp.maximum(h, 0.0)
        # Layer 3 (output layer, no activation) -> residual
        res = jnp.dot(h.astype(compute_dtype), w3_ref[j],
                      preferred_element_type=jnp.float32) + b3_ref[j]
        if emit_res:
            res_ref[j] = res.astype(res_ref.dtype)
        x = x + res                              # residual add, f32

    out_ref[...] = x.astype(out_ref.dtype)


@functools.partial(jax.jit,
                   static_argnames=("return_res", "block_b", "min_grid_steps",
                                    "compute_dtype"))
def mlp_resnet(x, w1, b1, w2, b2, w3, b3, *, return_res=True, block_b=1024,
               min_grid_steps=2, compute_dtype=jnp.float32):
    """Pallas implementation of MLPResnet.forward.

    Args:
      x : [B, input_size]
      w1: [n_blocks, input_size, hidden]   b1: [n_blocks, 1, hidden]
      w2: [n_blocks, hidden, hidden]       b2: [n_blocks, 1, hidden]
      w3: [n_blocks, hidden, input_size]   b3: [n_blocks, 1, input_size]
      return_res: if True, also return the list of per-block residuals.
      compute_dtype: dtype fed to the MXU (f32 or bf16); accumulation is f32.
    Returns:
      (x_out, [res_0, ..., res_{n-1}]) if return_res else x_out.
    """
    B, F = x.shape
    n_blocks, _, H = w1.shape

    tb = _choose_batch_tile(B, block_b, min_grid_steps)
    grid = (pl.cdiv(B, tb),)

    # Cast weights once in the wrapper (halves weight DMA for bf16); biases stay
    # f32 so the bias-add / ReLU run on the f32 VPU path (v5e has no bf16 VPU).
    w1c = w1.astype(compute_dtype)
    w2c = w2.astype(compute_dtype)
    w3c = w3.astype(compute_dtype)

    batched2 = lambda i: (i, 0)

    in_specs = [
        pl.BlockSpec((tb, F), batched2),           # x, tiled along batch
        _resident_spec((n_blocks, F, H)),          # w1
        _resident_spec((n_blocks, 1, H)),          # b1
        _resident_spec((n_blocks, H, H)),          # w2
        _resident_spec((n_blocks, 1, H)),          # b2
        _resident_spec((n_blocks, H, F)),          # w3
        _resident_spec((n_blocks, 1, F)),          # b3
    ]

    if return_res:
        out_shape = (
            jax.ShapeDtypeStruct((B, F), x.dtype),             # final x
            jax.ShapeDtypeStruct((n_blocks, B, F), x.dtype),   # stacked residuals
        )
        out_specs = (
            pl.BlockSpec((tb, F), batched2),
            pl.BlockSpec((n_blocks, tb, F), lambda i: (0, i, 0)),
        )
    else:
        out_shape = jax.ShapeDtypeStruct((B, F), x.dtype)
        out_specs = pl.BlockSpec((tb, F), batched2)

    kernel = functools.partial(_mlp_resnet_kernel, n_blocks=n_blocks,
                               compute_dtype=compute_dtype, emit_res=return_res)

    result = pl.pallas_call(
        kernel,
        out_shape=out_shape,
        grid_spec=pltpu.PrefetchScalarGridSpec(
            num_scalar_prefetch=0,
            grid=grid,
            in_specs=in_specs,
            out_specs=out_specs,
        ),
        compiler_params=pltpu.CompilerParams(
            dimension_semantics=("parallel",),
            vmem_limit_bytes=32 * 1024 * 1024,
        ),
    )(x, w1c, b1, w2c, b2, w3c, b3)

    if return_res:
        out, res_stack = result
        return out, [res_stack[j] for j in range(n_blocks)]
    return result


def _init_linear(key, in_f, out_f, dtype=jnp.float32):
    """torch.nn.Linear-style init; returns W^T ([in, out]) and b ([1, out])."""
    kw, kb = jax.random.split(key)
    bound = 1.0 / jnp.sqrt(in_f)
    w_t = jax.random.uniform(kw, (in_f, out_f), dtype, minval=-bound, maxval=bound)
    b = jax.random.uniform(kb, (1, out_f), dtype, minval=-bound, maxval=bound)
    return w_t, b


def _mlp_resnet_ref(x, w1, b1, w2, b2, w3, b3):
    residuals = []
    for j in range(w1.shape[0]):
        h = jnp.maximum(x @ w1[j] + b1[j], 0.0)
        h = jnp.maximum(h @ w2[j] + b2[j], 0.0)
        res = h @ w3[j] + b3[j]
        residuals.append(res)
        x = x + res
    return x, residuals


if __name__ == "__main__":
    input_size = 32
    hidden_size = 64
    n_blocks = 3
    batch = 64

    root = jax.random.PRNGKey(0)
    kx, kp = jax.random.split(root)
    x = jax.random.normal(kx, (batch, input_size), jnp.float32)

    block_keys = jax.random.split(kp, n_blocks)
    w1s, b1s, w2s, b2s, w3s, b3s = [], [], [], [], [], []
    for k in block_keys:
        k1, k2, k3 = jax.random.split(k, 3)
        w, b = _init_linear(k1, input_size, hidden_size); w1s.append(w); b1s.append(b)
        w, b = _init_linear(k2, hidden_size, hidden_size); w2s.append(w); b2s.append(b)
        w, b = _init_linear(k3, hidden_size, input_size); w3s.append(w); b3s.append(b)
    w1, b1 = jnp.stack(w1s), jnp.stack(b1s)
    w2, b2 = jnp.stack(w2s), jnp.stack(b2s)
    w3, b3 = jnp.stack(w3s), jnp.stack(b3s)

    # Pure-JAX reference of the same semantics.
    ref_out, ref_res = _mlp_resnet_ref(x, w1, b1, w2, b2, w3, b3)

    # 1) Full-precision path with residuals (return_res=True).
    out, residuals = mlp_resnet(x, w1, b1, w2, b2, w3, b3, return_res=True)
    jax.block_until_ready((out, residuals))
    assert jnp.allclose(out, ref_out, atol=1e-5, rtol=1e-5)
    for r, rr in zip(residuals, ref_res):
        assert jnp.allclose(r, rr, atol=1e-5, rtol=1e-5)

    # 2) Output-only path (drops ~n_blocks/(n_blocks+2) of the HBM writes).
    out_only = mlp_resnet(x, w1, b1, w2, b2, w3, b3, return_res=False)
    jax.block_until_ready(out_only)
    assert jnp.allclose(out_only, ref_out, atol=1e-5, rtol=1e-5)

    # 3) bf16 MXU path (v6e/v7x); f32 accumulation and f32 bias/ReLU.
    out_bf16, res_bf16 = mlp_resnet(x, w1, b1, w2, b2, w3, b3,
                                    compute_dtype=jnp.bfloat16)
    jax.block_until_ready((out_bf16, res_bf16))
    assert jnp.allclose(out_bf16, ref_out, atol=3e-2, rtol=3e-2)

    print("KERNEL_OK")
</pallas_src>

<mosaic_0001>
module attributes {stable_mosaic.version = 11 : i64} {
  func.func @_mlp_resnet_kernel(%arg0: i32, %arg1: memref<32x32xf32, #tpu.memory_space<vmem>>, %arg2: memref<3x32x64xf32, #tpu.memory_space<vmem>>, %arg3: memref<3x1x64xf32, #tpu.memory_space<vmem>>, %arg4: memref<3x64x64xf32, #tpu.memory_space<vmem>>, %arg5: memref<3x1x64xf32, #tpu.memory_space<vmem>>, %arg6: memref<3x64x32xf32, #tpu.memory_space<vmem>>, %arg7: memref<3x1x32xf32, #tpu.memory_space<vmem>>, %arg8: memref<32x32xf32, #tpu.memory_space<vmem>>, %arg9: memref<3x32x32xf32, #tpu.memory_space<vmem>>) attributes {dimension_semantics = [#tpu.dimension_semantics<parallel>], iteration_bounds = array<i64: 2>, scalar_prefetch = 0 : i64, scratch_operands = 0 : i64, tpu.core_type = #tpu.core_type<tc>, window_params = [{transform_indices = @transform_0, window_bounds = array<i64: 32, 32>}, {pipeline_mode = #tpu.pipeline_mode<synchronous>, transform_indices = @transform_1, window_bounds = array<i64: 3, 32, 64>}, {pipeline_mode = #tpu.pipeline_mode<synchronous>, transform_indices = @transform_2, window_bounds = array<i64: 3, 1, 64>}, {pipeline_mode = #tpu.pipeline_mode<synchronous>, transform_indices = @transform_3, window_bounds = array<i64: 3, 64, 64>}, {pipeline_mode = #tpu.pipeline_mode<synchronous>, transform_indices = @transform_4, window_bounds = array<i64: 3, 1, 64>}, {pipeline_mode = #tpu.pipeline_mode<synchronous>, transform_indices = @transform_5, window_bounds = array<i64: 3, 64, 32>}, {pipeline_mode = #tpu.pipeline_mode<synchronous>, transform_indices = @transform_6, window_bounds = array<i64: 3, 1, 32>}, {transform_indices = @transform_7, window_bounds = array<i64: 32, 32>}, {transform_indices = @transform_8, window_bounds = array<i64: 3, 32, 32>}]} {
    %c0 = arith.constant 0 : index
    %c0_0 = arith.constant 0 : index
    %0 = vector.load %arg1[%c0, %c0_0] : memref<32x32xf32, #tpu.memory_space<vmem>>, vector<32x32xf32>
    %c0_1 = arith.constant 0 : index
    %c0_2 = arith.constant 0 : index
    %c0_3 = arith.constant 0 : index
    %1 = vector.load %arg2[%c0_1, %c0_2, %c0_3] : memref<3x32x64xf32, #tpu.memory_space<vmem>>, vector<1x32x64xf32>
    %2 = vector.shape_cast %1 : vector<1x32x64xf32> to vector<32x64xf32>
    %cst = arith.constant dense<0.000000e+00> : vector<32x64xf32>
    %3 = tpu.matmul %0, %2, %cst {dimension_numbers = #tpu.dot_dimension_numbers<[1], [0], [0], [1], [0, 0, 1, 1], [], []>} : vector<32x32xf32>, vector<32x64xf32>, vector<32x64xf32> -> vector<32x64xf32>
    %c0_4 = arith.constant 0 : index
    %c0_5 = arith.constant 0 : index
    %c0_6 = arith.constant 0 : index
    %4 = vector.load %arg3[%c0_4, %c0_5, %c0_6] : memref<3x1x64xf32, #tpu.memory_space<vmem>>, vector<1x1x64xf32>
    %5 = vector.shape_cast %4 : vector<1x1x64xf32> to vector<1x64xf32>
    %6 = vector.broadcast %5 : vector<1x64xf32> to vector<32x64xf32>
    %7 = arith.addf %3, %6 : vector<32x64xf32>
    %cst_7 = arith.constant 0.000000e+00 : f32
    %8 = vector.broadcast %cst_7 : f32 to vector<32x64xf32>
    %9 = arith.maximumf %7, %8 : vector<32x64xf32>
    %c0_8 = arith.constant 0 : index
    %c0_9 = arith.constant 0 : index
    %c0_10 = arith.constant 0 : index
    %10 = vector.load %arg4[%c0_8, %c0_9, %c0_10] : memref<3x64x64xf32, #tpu.memory_space<vmem>>, vector<1x64x64xf32>
    %11 = vector.shape_cast %10 : vector<1x64x64xf32> to vector<64x64xf32>
    %cst_11 = arith.constant dense<0.000000e+00> : vector<32x64xf32>
    %12 = tpu.matmul %9, %11, %cst_11 {dimension_numbers = #tpu.dot_dimension_numbers<[1], [0], [0], [1], [0, 0, 1, 1], [], []>} : vector<32x64xf32>, vector<64x64xf32>, vector<32x64xf32> -> vector<32x64xf32>
    %c0_12 = arith.constant 0 : index
    %c0_13 = arith.constant 0 : index
    %c0_14 = arith.constant 0 : index
    %13 = vector.load %arg5[%c0_12, %c0_13, %c0_14] : memref<3x1x64xf32, #tpu.memory_space<vmem>>, vector<1x1x64xf32>
    %14 = vector.shape_cast %13 : vector<1x1x64xf32> to vector<1x64xf32>
    %15 = vector.broadcast %14 : vector<1x64xf32> to vector<32x64xf32>
    %16 = arith.addf %12, %15 : vector<32x64xf32>
    %cst_15 = arith.constant 0.000000e+00 : f32
    %17 = vector.broadcast %cst_15 : f32 to vector<32x64xf32>
    %18 = arith.maximumf %16, %17 : vector<32x64xf32>
    %c0_16 = arith.constant 0 : index
    %c0_17 = arith.constant 0 : index
    %c0_18 = arith.constant 0 : index
    %19 = vector.load %arg6[%c0_16, %c0_17, %c0_18] : memref<3x64x32xf32, #tpu.memory_space<vmem>>, vector<1x64x32xf32>
    %20 = vector.shape_cast %19 : vector<1x64x32xf32> to vector<64x32xf32>
    %cst_19 = arith.constant dense<0.000000e+00> : vector<32x32xf32>
    %21 = tpu.matmul %18, %20, %cst_19 {dimension_numbers = #tpu.dot_dimension_numbers<[1], [0], [0], [1], [0, 0, 1, 1], [], []>} : vector<32x64xf32>, vector<64x32xf32>, vector<32x32xf32> -> vector<32x32xf32>
    %c0_20 = arith.constant 0 : index
    %c0_21 = arith.constant 0 : index
    %c0_22 = arith.constant 0 : index
    %22 = vector.load %arg7[%c0_20, %c0_21, %c0_22] : memref<3x1x32xf32, #tpu.memory_space<vmem>>, vector<1x1x32xf32>
    %23 = vector.shape_cast %22 : vector<1x1x32xf32> to vector<1x32xf32>
    %24 = vector.broadcast %23 : vector<1x32xf32> to vector<32x32xf32>
    %25 = arith.addf %21, %24 : vector<32x32xf32>
    %c0_23 = arith.constant 0 : index
    %c0_24 = arith.constant 0 : index
    %c0_25 = arith.constant 0 : index
    %26 = vector.load %arg9[%c0_23, %c0_24, %c0_25] : memref<3x32x32xf32, #tpu.memory_space<vmem>>, vector<1x32x32xf32>
    %27 = vector.shape_cast %26 : vector<1x32x32xf32> to vector<32x32xf32>
    %28 = vector.shape_cast %25 : vector<32x32xf32> to vector<1x32x32xf32>
    tpu.vector_store %arg9[%c0_23, %c0_24, %c0_25], %28 {strides = array<i32>} : memref<3x32x32xf32, #tpu.memory_space<vmem>>, vector<1x32x32xf32>,
    %29 = arith.addf %0, %25 : vector<32x32xf32>
    %c1 = arith.constant 1 : index
    %c0_26 = arith.constant 0 : index
    %c0_27 = arith.constant 0 : index
    %30 = vector.load %arg2[%c1, %c0_26, %c0_27] : memref<3x32x64xf32, #tpu.memory_space<vmem>>, vector<1x32x64xf32>
    %31 = vector.shape_cast %30 : vector<1x32x64xf32> to vector<32x64xf32>
    %cst_28 = arith.constant dense<0.000000e+00> : vector<32x64xf32>
    %32 = tpu.matmul %29, %31, %cst_28 {dimension_numbers = #tpu.dot_dimension_numbers<[1], [0], [0], [1], [0, 0, 1, 1], [], []>} : vector<32x32xf32>, vector<32x64xf32>, vector<32x64xf32> -> vector<32x64xf32>
    %c1_29 = arith.constant 1 : index
    %c0_30 = arith.constant 0 : index
    %c0_31 = arith.constant 0 : index
    %33 = vector.load %arg3[%c1_29, %c0_30, %c0_31] : memref<3x1x64xf32, #tpu.memory_space<vmem>>, vector<1x1x64xf32>
    %34 = vector.shape_cast %33 : vector<1x1x64xf32> to vector<1x64xf32>
    %35 = vector.broadcast %34 : vector<1x64xf32> to vector<32x64xf32>
    %36 = arith.addf %32, %35 : vector<32x64xf32>
    %cst_32 = arith.constant 0.000000e+00 : f32
    %37 = vector.broadcast %cst_32 : f32 to vector<32x64xf32>
    %38 = arith.maximumf %36, %37 : vector<32x64xf32>
    %c1_33 = arith.constant 1 : index
    %c0_34 = arith.constant 0 : index
    %c0_35 = arith.constant 0 : index
    %39 = vector.load %arg4[%c1_33, %c0_34, %c0_35] : memref<3x64x64xf32, #tpu.memory_space<vmem>>, vector<1x64x64xf32>
    %40 = vector.shape_cast %39 : vector<1x64x64xf32> to vector<64x64xf32>
    %cst_36 = arith.constant dense<0.000000e+00> : vector<32x64xf32>
    %41 = tpu.matmul %38, %40, %cst_36 {dimension_numbers = #tpu.dot_dimension_numbers<[1], [0], [0], [1], [0, 0, 1, 1], [], []>} : vector<32x64xf32>, vector<64x64xf32>, vector<32x64xf32> -> vector<32x64xf32>
    %c1_37 = arith.constant 1 : index
    %c0_38 = arith.constant 0 : index
    %c0_39 = arith.constant 0 : index
    %42 = vector.load %arg5[%c1_37, %c0_38, %c0_39] : memref<3x1x64xf32, #tpu.memory_space<vmem>>, vector<1x1x64xf32>
    %43 = vector.shape_cast %42 : vector<1x1x64xf32> to vector<1x64xf32>
    %44 = vector.broadcast %43 : vector<1x64xf32> to vector<32x64xf32>
    %45 = arith.addf %41, %44 : vector<32x64xf32>
    %cst_40 = arith.constant 0.000000e+00 : f32
    %46 = vector.broadcast %cst_40 : f32 to vector<32x64xf32>
    %47 = arith.maximumf %45, %46 : vector<32x64xf32>
    %c1_41 = arith.constant 1 : index
    %c0_42 = arith.constant 0 : index
    %c0_43 = arith.constant 0 : index
    %48 = vector.load %arg6[%c1_41, %c0_42, %c0_43] : memref<3x64x32xf32, #tpu.memory_space<vmem>>, vector<1x64x32xf32>
    %49 = vector.shape_cast %48 : vector<1x64x32xf32> to vector<64x32xf32>
    %cst_44 = arith.constant dense<0.000000e+00> : vector<32x32xf32>
    %50 = tpu.matmul %47, %49, %cst_44 {dimension_numbers = #tpu.dot_dimension_numbers<[1], [0], [0], [1], [0, 0, 1, 1], [], []>} : vector<32x64xf32>, vector<64x32xf32>, vector<32x32xf32> -> vector<32x32xf32>
    %c1_45 = arith.constant 1 : index
    %c0_46 = arith.constant 0 : index
    %c0_47 = arith.constant 0 : index
    %51 = vector.load %arg7[%c1_45, %c0_46, %c0_47] : memref<3x1x32xf32, #tpu.memory_space<vmem>>, vector<1x1x32xf32>
    %52 = vector.shape_cast %51 : vector<1x1x32xf32> to vector<1x32xf32>
    %53 = vector.broadcast %52 : vector<1x32xf32> to vector<32x32xf32>
    %54 = arith.addf %50, %53 : vector<32x32xf32>
    %c1_48 = arith.constant 1 : index
    %c0_49 = arith.constant 0 : index
    %c0_50 = arith.constant 0 : index
    %55 = vector.load %arg9[%c1_48, %c0_49, %c0_50] : memref<3x32x32xf32, #tpu.memory_space<vmem>>, vector<1x32x32xf32>
    %56 = vector.shape_cast %55 : vector<1x32x32xf32> to vector<32x32xf32>
    %57 = vector.shape_cast %54 : vector<32x32xf32> to vector<1x32x32xf32>
    tpu.vector_store %arg9[%c1_48, %c0_49, %c0_50], %57 {strides = array<i32>} : memref<3x32x32xf32, #tpu.memory_space<vmem>>, vector<1x32x32xf32>,
    %58 = arith.addf %29, %54 : vector<32x32xf32>
    %c2 = arith.constant 2 : index
    %c0_51 = arith.constant 0 : index
    %c0_52 = arith.constant 0 : index
    %59 = vector.load %arg2[%c2, %c0_51, %c0_52] : memref<3x32x64xf32, #tpu.memory_space<vmem>>, vector<1x32x64xf32>
    %60 = vector.shape_cast %59 : vector<1x32x64xf32> to vector<32x64xf32>
    %cst_53 = arith.constant dense<0.000000e+00> : vector<32x64xf32>
    %61 = tpu.matmul %58, %60, %cst_53 {dimension_numbers = #tpu.dot_dimension_numbers<[1], [0], [0], [1], [0, 0, 1, 1], [], []>} : vector<32x32xf32>, vector<32x64xf32>, vector<32x64xf32> -> vector<32x64xf32>
    %c2_54 = arith.constant 2 : index
    %c0_55 = arith.constant 0 : index
    %c0_56 = arith.constant 0 : index
    %62 = vector.load %arg3[%c2_54, %c0_55, %c0_56] : memref<3x1x64xf32, #tpu.memory_space<vmem>>, vector<1x1x64xf32>
    %63 = vector.shape_cast %62 : vector<1x1x64xf32> to vector<1x64xf32>
    %64 = vector.broadcast %63 : vector<1x64xf32> to vector<32x64xf32>
    %65 = arith.addf %61, %64 : vector<32x64xf32>
    %cst_57 = arith.constant 0.000000e+00 : f32
    %66 = vector.broadcast %cst_57 : f32 to vector<32x64xf32>
    %67 = arith.maximumf %65, %66 : vector<32x64xf32>
    %c2_58 = arith.constant 2 : index
    %c0_59 = arith.constant 0 : index
    %c0_60 = arith.constant 0 : index
    %68 = vector.load %arg4[%c2_58, %c0_59, %c0_60] : memref<3x64x64xf32, #tpu.memory_space<vmem>>, vector<1x64x64xf32>
    %69 = vector.shape_cast %68 : vector<1x64x64xf32> to vector<64x64xf32>
    %cst_61 = arith.constant dense<0.000000e+00> : vector<32x64xf32>
    %70 = tpu.matmul %67, %69, %cst_61 {dimension_numbers = #tpu.dot_dimension_numbers<[1], [0], [0], [1], [0, 0, 1, 1], [], []>} : vector<32x64xf32>, vector<64x64xf32>, vector<32x64xf32> -> vector<32x64xf32>
    %c2_62 = arith.constant 2 : index
    %c0_63 = arith.constant 0 : index
    %c0_64 = arith.constant 0 : index
    %71 = vector.load %arg5[%c2_62, %c0_63, %c0_64] : memref<3x1x64xf32, #tpu.memory_space<vmem>>, vector<1x1x64xf32>
    %72 = vector.shape_cast %71 : vector<1x1x64xf32> to vector<1x64xf32>
    %73 = vector.broadcast %72 : vector<1x64xf32> to vector<32x64xf32>
    %74 = arith.addf %70, %73 : vector<32x64xf32>
    %cst_65 = arith.constant 0.000000e+00 : f32
    %75 = vector.broadcast %cst_65 : f32 to vector<32x64xf32>
    %76 = arith.maximumf %74, %75 : vector<32x64xf32>
    %c2_66 = arith.constant 2 : index
    %c0_67 = arith.constant 0 : index
    %c0_68 = arith.constant 0 : index
    %77 = vector.load %arg6[%c2_66, %c0_67, %c0_68] : memref<3x64x32xf32, #tpu.memory_space<vmem>>, vector<1x64x32xf32>
    %78 = vector.shape_cast %77 : vector<1x64x32xf32> to vector<64x32xf32>
    %cst_69 = arith.constant dense<0.000000e+00> : vector<32x32xf32>
    %79 = tpu.matmul %76, %78, %cst_69 {dimension_numbers = #tpu.dot_dimension_numbers<[1], [0], [0], [1], [0, 0, 1, 1], [], []>} : vector<32x64xf32>, vector<64x32xf32>, vector<32x32xf32> -> vector<32x32xf32>
    %c2_70 = arith.constant 2 : index
    %c0_71 = arith.constant 0 : index
    %c0_72 = arith.constant 0 : index
    %80 = vector.load %arg7[%c2_70, %c0_71, %c0_72] : memref<3x1x32xf32, #tpu.memory_space<vmem>>, vector<1x1x32xf32>
    %81 = vector.shape_cast %80 : vector<1x1x32xf32> to vector<1x32xf32>
    %82 = vector.broadcast %81 : vector<1x32xf32> to vector<32x32xf32>
    %83 = arith.addf %79, %82 : vector<32x32xf32>
    %c2_73 = arith.constant 2 : index
    %c0_74 = arith.constant 0 : index
    %c0_75 = arith.constant 0 : index
    %84 = vector.load %arg9[%c2_73, %c0_74, %c0_75] : memref<3x32x32xf32, #tpu.memory_space<vmem>>, vector<1x32x32xf32>
    %85 = vector.shape_cast %84 : vector<1x32x32xf32> to vector<32x32xf32>
    %86 = vector.shape_cast %83 : vector<32x32xf32> to vector<1x32x32xf32>
    tpu.vector_store %arg9[%c2_73, %c0_74, %c0_75], %86 {strides = array<i32>} : memref<3x32x32xf32, #tpu.memory_space<vmem>>, vector<1x32x32xf32>,
    %87 = arith.addf %58, %83 : vector<32x32xf32>
    %c0_76 = arith.constant 0 : index
    %c0_77 = arith.constant 0 : index
    %88 = vector.load %arg8[%c0_76, %c0_77] : memref<32x32xf32, #tpu.memory_space<vmem>>, vector<32x32xf32>
    tpu.vector_store %arg8[%c0_76, %c0_77], %87 {strides = array<i32>} : memref<32x32xf32, #tpu.memory_space<vmem>>, vector<32x32xf32>,
    return
  }
  func.func @transform_0(%arg0: i32) -> (i32, i32) {
    %c0_i32 = arith.constant 0 : i32
    %c0_i32_0 = arith.constant 0 : i32
    return %arg0, %c0_i32 : i32, i32
  }
  func.func @transform_1(%arg0: i32) -> (i32, i32, i32) {
    %c0_i32 = arith.constant 0 : i32
    %c0_i32_0 = arith.constant 0 : i32
    %c0_i32_1 = arith.constant 0 : i32
    %c0_i32_2 = arith.constant 0 : i32
    return %c0_i32, %c0_i32_0, %c0_i32_1 : i32, i32, i32
  }
  func.func @transform_2(%arg0: i32) -> (i32, i32, i32) {
    %c0_i32 = arith.constant 0 : i32
    %c0_i32_0 = arith.constant 0 : i32
    %c0_i32_1 = arith.constant 0 : i32
    %c0_i32_2 = arith.constant 0 : i32
    return %c0_i32, %c0_i32_0, %c0_i32_1 : i32, i32, i32
  }
  func.func @transform_3(%arg0: i32) -> (i32, i32, i32) {
    %c0_i32 = arith.constant 0 : i32
    %c0_i32_0 = arith.constant 0 : i32
    %c0_i32_1 = arith.constant 0 : i32
    %c0_i32_2 = arith.constant 0 : i32
    return %c0_i32, %c0_i32_0, %c0_i32_1 : i32, i32, i32
  }
  func.func @transform_4(%arg0: i32) -> (i32, i32, i32) {
    %c0_i32 = arith.constant 0 : i32
    %c0_i32_0 = arith.constant 0 : i32
    %c0_i32_1 = arith.constant 0 : i32
    %c0_i32_2 = arith.constant 0 : i32
    return %c0_i32, %c0_i32_0, %c0_i32_1 : i32, i32, i32
  }
  func.func @transform_5(%arg0: i32) -> (i32, i32, i32) {
    %c0_i32 = arith.constant 0 : i32
    %c0_i32_0 = arith.constant 0 : i32
    %c0_i32_1 = arith.constant 0 : i32
    %c0_i32_2 = arith.constant 0 : i32
    return %c0_i32, %c0_i32_0, %c0_i32_1 : i32, i32, i32
  }
  func.func @transform_6(%arg0: i32) -> (i32, i32, i32) {
    %c0_i32 = arith.constant 0 : i32
    %c0_i32_0 = arith.constant 0 : i32
    %c0_i32_1 = arith.constant 0 : i32
    %c0_i32_2 = arith.constant 0 : i32
    return %c0_i32, %c0_i32_0, %c0_i32_1 : i32, i32, i32
  }
  func.func @transform_7(%arg0: i32) -> (i32, i32) {
    %c0_i32 = arith.constant 0 : i32
    %c0_i32_0 = arith.constant 0 : i32
    return %arg0, %c0_i32 : i32, i32
  }
  func.func @transform_8(%arg0: i32) -> (i32, i32, i32) {
    %c0_i32 = arith.constant 0 : i32
    %c0_i32_0 = arith.constant 0 : i32
    %c0_i32_1 = arith.constant 0 : i32
    return %c0_i32, %arg0, %c0_i32_0 : i32, i32, i32
  }
}

</mosaic_0001>

<bundles_post_ra>
// kernel: mlp_resnet.1
= control target key start
LH: loop header
LB: loop body
LE: loop exit
PB: predicated region body
PF: predicated region fallthrough
CT: control target
= control target key end

     0   :  { %s2152_s27 = smov 0   ;;  %s2154_s28 = smov 0   ;;  %s2545_s0 = inlined_call_operand.vmem [shape: f32[64,32], index: 0, kind: input, shape index: {}]   ;;  %s2546_s1 = inlined_call_operand.vmem [shape: f32[3,32,64], index: 1, kind: input, shape index: {}]   ;;  %s2547_s2 = inlined_call_operand.vmem [shape: f32[3,1,64], index: 2, kind: input, shape index: {}]   ;;  %s2548_s3 = inlined_call_operand.vmem [shape: f32[3,64,64], index: 3, kind: input, shape index: {}]   ;;  %s2549_s4 = inlined_call_operand.vmem [shape: f32[3,1,64], index: 4, kind: input, shape index: {}]   ;;  %s2550_s5 = inlined_call_operand.vmem [shape: f32[3,64,32], index: 5, kind: input, shape index: {}]   ;;  %s2551_s6 = inlined_call_operand.vmem [shape: f32[3,1,32], index: 6, kind: input, shape index: {}]   ;;  %s2552_s7 = inlined_call_operand.vmem [shape: f32[64,32], index: 7, kind: output, shape index: {0}]   ;;  %s2553_s8 = inlined_call_operand.vmem [shape: f32[3,64,32], index: 8, kind: output, shape index: {1}]  }
   0x1   :  { %s2156_s29 = smov 0  }
   0x2 LB: > { %s2165_s30 = sadd.s32 4294967295, %s2105_s29   ;;  %s2167_s9 = sadd.s32 1, %s2105_s29   ;;  %s2105_s29 = sphi %s2156_s29, %s2557_s29   ;;  %s2101_s28 = sphi %s2154_s28, %s2556_s28   ;;  %s2097_s27 = sphi %s2152_s27, %s2555_s27  }
   0x3   : > { %s201_s10 = ssub.s32 %s2105_s29, %s2167_s9  ;;  %s204_s11 = sadd.s32 1, %s2101_s28 }
   0x4   : > { %p202_p0 = scmp.eq.s32.totalorder %s201_s10, 0  ;;  %p214_p1 = scmp.ne.s32.totalorder %s2101_s28, %s2097_s27 }
   0x5   : > { %p215_p2 = scmp.eq.s32.totalorder %s2165_s30, 1  ;;  %p1559_p3 = scmp.ge.s32.totalorder %s2105_s29, 1 }
   0x6   : > { %s2175_s12 = scalar_select %p202_p0, %s2101_s28, %s204_s11  }
   0x7   : > { %p2177_p4 = por %p215_p2, %p214_p1  ;;  %p266_p5 = scmp.lt.s32.totalorder %s2105_s29, 3 }
   0x9   : > { %p267_p6 = pnand %p1559_p3, %p266_p5 }
   0xa   : > { %v321_v0 = vld [vmem:[%s2546_s1] sm:$0xff] (!%p267_p6)  ;;  %v322_v1 = vld [vmem:[%s2546_s1 + $0x8] sm:$0xff] (!%p267_p6)  ;;  %v323_v2 = vld [vmem:[%s2546_s1 + $0x10] sm:$0xff] (!%p267_p6)  ;;  %s1560_s20 = sshll.u32 (!%p267_p6), %s2165_s30, 2  ;;  %vm332_vm0 = vcmask (!%p267_p6), 261120   ;;  %vm449_vm1 = vcmask (!%p267_p6), 523264  }
   0xb   : > { %270 = sbr.rel (%p267_p6) target bundleno = 1995 (0x7cb), region = 48  ;;  %v1938_v3 = vpack.c.bf16 (!%p267_p6), %v322_v1, %v321_v0  ;;  %v324_v4 = vld [vmem:[%s2546_s1 + $0x18] sm:$0xff] (!%p267_p6)  ;;  %p305_p7 = scmp.lt.s32.totalorder (!%p267_p6), %s1560_s20, 7  ;;  %v434_v5 = vld [vmem:[%s2548_s3] sm:$0xff] (!%p267_p6)  ;;  %v435_v6 = vld [vmem:[%s2548_s3 + $0x8] sm:$0xff] (!%p267_p6) }
   0xc   : > { %v1942_v7 = vpack.c.bf16 (!%p267_p6), %v324_v4, %v323_v2  ;;  %v1946_v8 = vpack.c.bf16 (!%p267_p6), %v435_v6, %v434_v5  ;;  %v436_v9 = vld [vmem:[%s2548_s3 + $0x10] sm:$0xff] (!%p267_p6)  ;;  %v437_v10 = vld [vmem:[%s2548_s3 + $0x18] sm:$0xff] (!%p267_p6)  ;;  %v438_v12 = vld [vmem:[%s2548_s3 + $0x20] sm:$0xff] (!%p267_p6)  ;;  %s301_s26 = sand.u32 (!%p267_p6), 1, %s2097_s27  }
   0xd   : > { %1939 = vmatprep.subr.bf16.mxu0 (!%p267_p6), %v1938_v3  ;;  %v1950_v11 = vpack.c.bf16 (!%p267_p6), %v437_v10, %v436_v9  ;;  %v439_v13 = vld [vmem:[%s2548_s3 + $0x28] sm:$0xff] (!%p267_p6)  ;;  %v440_v19 = vld [vmem:[%s2548_s3 + $0x30] sm:$0xff] (!%p267_p6)  ;;  %v441_v20 = vld [vmem:[%s2548_s3 + $0x38] sm:$0xff] (!%p267_p6)  ;;  %s2058_s29 = smul.u32 (!%p267_p6), 96, %s301_s26 }
   0xe   : > { %1941 = vmatpush3.bf16.msra.mxu0 (!%p267_p6), %v1938_v3  ;;  %1947 = vmatprep.subr.bf16.mxu1 (!%p267_p6), %v1946_v8  ;;  %v1954_v14 = vpack.c.bf16 (!%p267_p6), %v439_v13, %v438_v12  ;;  %v1958_v21 = vpack.c.bf16 (!%p267_p6), %v441_v20, %v440_v19  ;;  %v551_v22 = vld [vmem:[%s2550_s5] sm:$0xff] (!%p267_p6)  ;;  %v552_v23 = vld [vmem:[%s2550_s5 + $0x8] sm:$0xff] (!%p267_p6)  ;;  %v553_v24 = vld [vmem:[%s2550_s5 + $0x10] sm:$0xff] (!%p267_p6) }
   0xf   : > { %1943 = vmatprep.subr.bf16.mxu0 (!%p267_p6), %v1942_v7  ;;  %1949 = vmatpush3.bf16.msra.mxu1 (!%p267_p6), %v1946_v8  ;;  %v1962_v25 = vpack.c.bf16 (!%p267_p6), %v552_v23, %v551_v22  ;;  %v554_v26 = vld [vmem:[%s2550_s5 + $0x18] sm:$0xff] (!%p267_p6)  ;;  %v555_v28 = vld [vmem:[%s2550_s5 + $0x20] sm:$0xff] (!%p267_p6)  ;;  %v556_v29 = vld [vmem:[%s2550_s5 + $0x28] sm:$0xff] (!%p267_p6)  ;;  %s2314_s14 = scalar_lea.vmem (!%p267_p6), [#allocation2], %s2058_s29 }
  0x10   : > { %1951 = vmatprep.subr.bf16.mxu1 (!%p267_p6), %v1950_v11  ;;  %v1966_v27 = vpack.c.bf16 (!%p267_p6), %v554_v26, %v553_v24  ;;  %v1970_v30 = vpack.c.bf16 (!%p267_p6), %v556_v29, %v555_v28  ;;  %v1564_v31 = vld [vmem:[%s2547_s2] ss:$0 sm:$0xff] (!%p267_p6)  ;;  %v557_v44 = vld [vmem:[%s2550_s5 + $0x30] sm:$0xff] (!%p267_p6)  ;;  %v558_v45 = vld [vmem:[%s2550_s5 + $0x38] sm:$0xff] (!%p267_p6) }
  0x11   : > { %v1974_v46 = vpack.c.bf16 (!%p267_p6), %v558_v45, %v557_v44  ;;  %v1579_v47 = vld [vmem:[%s2546_s1 + $0x20] sm:$0xff] (!%p267_p6)  ;;  %v1580_v48 = vld [vmem:[%s2546_s1 + $0x28] sm:$0xff] (!%p267_p6)  ;;  %v1581_v63 = vld [vmem:[%s2546_s1 + $0x30] sm:$0xff] (!%p267_p6) }
  0x12   : > { %s2559_s20 = smov (!%p305_p7, %s1560_s20), 7  ;;  %1945 = vmatpush3.bf16.msra.mxu0 %v1942_v7  ;;  %v1978_v49 = vpack.c.bf16 %v1580_v48, %v1579_v47  ;;  %v1569_v50 = vld [vmem:[%s2549_s4] ss:$0 sm:$0xff]  ;;  %v1582_v0 = vld [vmem:[%s2546_s1 + $0x38] sm:$0xff]  ;;  %v1590_v3 = vld [vmem:[%s2548_s3 + $0x48] sm:$0xff] }
  0x13   : > { %s1561_s19 = sshll.u32 %s2559_s20, 3  ;;  %1953 = vmatpush3.bf16.msra.mxu1 %v1950_v11  ;;  %1963 = vmatprep.subr.bf16.mxu0 %v1962_v25  ;;  %v1982_v1 = vpack.c.bf16 %v1582_v0, %v1581_v63  ;;  %v1589_v2 = vld [vmem:[%s2548_s3 + $0x40] sm:$0xff]  ;;  %v1591_v4 = vld [vmem:[%s2548_s3 + $0x50] sm:$0xff]  ;;  %v1592_v6 = vld [vmem:[%s2548_s3 + $0x58] sm:$0xff]  ;;  %s1667_s20 = sshll.u32 (%p2177_p4), %s2165_s30, 5 }
  0x14   : > { %s308_s23 = scalar_lea.vmem %s2545_s0, %s1561_s19  ;;  %1955 = vmatprep.subr.bf16.mxu1 %v1954_v14  ;;  %v1986_v5 = vpack.c.bf16 %v1590_v3, %v1589_v2  ;;  %v1990_v7 = vpack.c.bf16 %v1592_v6, %v1591_v4  ;;  %v1593_v8 = vld [vmem:[%s2548_s3 + $0x60] sm:$0xff]  ;;  %v1594_v9 = vld [vmem:[%s2548_s3 + $0x68] sm:$0xff]  ;;  %v1605_v29 = vld [vmem:[%s2550_s5 + $0x50] sm:$0xff]  ;;  %s314_s18 = scalar_lea.vmem %s2552_s7, %s1561_s19 }
  0x15   : > { %v2220_v15 = vld [vmem:[%s308_s23] sm:$0xff]  ;;  %v2224_v16 = vld [vmem:[%s308_s23 + $0x8] sm:$0xff]  ;;  %v2226_v17 = vld [vmem:[%s308_s23 + $0x10] sm:$0xff]  ;;  %v1994_v10 = vpack.c.bf16 %v1594_v9, %v1593_v8  ;;  %s1403_s22 = scalar_lea.vmem (%p2177_p4), %s2553_s8, %s1667_s20 }
  0x16   : > { %1772 = vmatprep.mubr.msk.f32.mxu0 %vm332_vm0, %v2220_v15  ;;  %v2232_v18 = vld [vmem:[%s308_s23 + $0x18] sm:$0xff]  ;;  %v1574_v11 = vld [vmem:[%s2551_s6] ss:$0 sm:$0xff]  ;;  %v1623_v4 = vld [vmem:[%s2546_s1 + $0x50] sm:$0xff] }
  0x17   : > { %1773 = vmatmul.mubr.msk.f32.vlgmr.msra.gmra.mrb[0].mxu0 %vm332_vm0, %v2224_v16  ;;  %1957 = vmatpush3.bf16.msra.mxu1 %v1954_v14  ;;  %v1632_v8 = vld [vmem:[%s2548_s3 + $0x88] sm:$0xff]  ;;  %v1633_v9 = vld [vmem:[%s2548_s3 + $0x90] sm:$0xff] }
  0x18   : > { %1775 = vmatprep.mubr.msk.f32.mxu0 %vm332_vm0, %v2226_v17  ;;  %1959 = vmatprep.subr.bf16.mxu1 %v1958_v21 }
  0x19   : > { %1965 = vmatpush3.bf16.msra.mxu0 %v1962_v25 }
  0x1a   : > { %1967 = vmatprep.subr.bf16.mxu0 %v1966_v27 }
  0x1b   : > { %1776 = vmatmul.mubr.msk.f32.gmra.mrb[2].mxu0 %vm332_vm0, %v2232_v18  ;;  %1961 = vmatpush3.bf16.msra.mxu1 %v1958_v21 }
  0x1c   : > { %1979 = vmatprep.subr.bf16.mxu1 %v1978_v49 }
  0x1d   : > { %1969 = vmatpush3.bf16.msra.mxu0 %v1966_v27  ;;  %v1596_v27 = vld [vmem:[%s2548_s3 + $0x78] sm:$0xff] }
  0x1e   : > { %1971 = vmatprep.subr.bf16.mxu0 %v1970_v30 }
  0x21   : > { %1973 = vmatpush3.bf16.msra.mxu0 %v1970_v30 }
  0x22   : > { %1975 = vmatprep.subr.bf16.mxu0 %v1974_v46 }
  0x25   : > { %1977 = vmatpush3.bf16.msra.mxu0 %v1974_v46 }
  0x26   : > { %1987 = vmatprep.subr.bf16.mxu0 %v1986_v5 }
  0xea   : > { %v1774_v32 = vpop.f32.mrb[0].mxu0 }
  0xeb   : > { %v417_v33 = vadd.f32 %v1774_v32, %v1564_v31  ;;  %v411_v34 = vpop.f32.mrb[1].mxu0 }
  0xec   : > { %v412_v35 = vadd.f32 %v1564_v31, %v411_v34  ;;  %v1608_v34 = vld [vmem:[%s2550_s5 + $0x68] sm:$0xff] }
  0xed   : > { %v431_v38 = vmax.f32 %v417_v33, 0.0  ;;  %v1607_v33 = vld [vmem:[%s2550_s5 + $0x60] sm:$0xff] }
  0xee   : > { %v430_v36 = vmax.f32 %v412_v35, 0.0  ;;  %v1777_v37 = vpop.f32.mrb[2].mxu0  ;;  %v2010_v35 = vpack.c.bf16 %v1608_v34, %v1607_v33  ;;  %v1647_v34 = vld [vmem:[%s2550_s5 + $0x90] sm:$0xff] }
  0xef   : > { %v427_v39 = vadd.f32 %v1777_v37, %v1564_v31  ;;  %v421_v40 = vpop.f32.mrb[3].mxu0 }
  0xf0   : > { %v422_v41 = vadd.f32 %v1564_v31, %v421_v40  ;;  %1794 = vmatprep.mubr.msk.f32.mxu1 %vm449_vm1, %v430_v36  ;;  %v1606_v31 = vld [vmem:[%s2550_s5 + $0x58] sm:$0xff]  ;;  %v1584_v36 = vld [vmem:[%s2547_s2 + $0x1] ss:$0 sm:$0xff] }
  0xf1   : > { %1795 = vmatmul.mubr.msk.f32.vlgmr.msra.gmra.mrb[0].mxu1 %vm449_vm1, %v431_v38  ;;  %v433_v43 = vmax.f32 %v427_v39, 0.0  ;;  %v2006_v32 = vpack.c.bf16 %v1606_v31, %v1605_v29 }
  0xf2   : > { %v432_v42 = vmax.f32 %v422_v41, 0.0  ;;  %1981 = vmatpush3.bf16.msra.mxu1 %v1978_v49  ;;  %v1609_v49 = vld [vmem:[%s2550_s5 + $0x70] sm:$0xff] }
  0xf3   : > { %1983 = vmatprep.subr.bf16.mxu1 %v1982_v1 }
  0xf4   : > { %1797 = vmatprep.mubr.msk.f32.mxu1 %vm449_vm1, %v432_v42 }
  0xf5   : > { %1798 = vmatmul.mubr.msk.f32.gmra.mrb[2].mxu1 %vm449_vm1, %v433_v43 }
  0xf6   : > { %1985 = vmatpush3.bf16.msra.mxu1 %v1982_v1 }
 0x1c4   : > { %v1796_v51 = vpop.f32.mrb[0].mxu1 }
 0x1c5   : > { %v534_v52 = vadd.f32 %v1796_v51, %v1569_v50  ;;  %v528_v53 = vpop.f32.mrb[1].mxu1 }
 0x1c6   : > { %v529_v54 = vadd.f32 %v1569_v50, %v528_v53  ;;  %v1622_v53 = vld [vmem:[%s2546_s1 + $0x48] sm:$0xff] }
 0x1c7   : > { %v548_v57 = vmax.f32 %v534_v52, 0.0  ;;  %v1621_v52 = vld [vmem:[%s2546_s1 + $0x40] sm:$0xff] }
 0x1c8   : > { %v547_v55 = vmax.f32 %v529_v54, 0.0  ;;  %v1799_v56 = vpop.f32.mrb[2].mxu1  ;;  %v2018_v54 = vpack.c.bf16 %v1622_v53, %v1621_v52 }
 0x1c9   : > { %v544_v58 = vadd.f32 %v1799_v56, %v1569_v50  ;;  %v538_v59 = vpop.f32.mrb[3].mxu1 }
 0x1ca   : > { %v539_v60 = vadd.f32 %v1569_v50, %v538_v59  ;;  %1816 = vmatprep.mubr.msk.f32.mxu0 %vm449_vm1, %v547_v55  ;;  %v1610_v50 = vld [vmem:[%s2550_s5 + $0x78] sm:$0xff]  ;;  %v1598_v55 = vld [vmem:[%s2549_s4 + $0x1] ss:$0 sm:$0xff] }
 0x1cb   : > { %1817 = vmatmul.mubr.msk.f32.vlgmr.msra.gmra.mrb[4].mxu0 %vm449_vm1, %v548_v57  ;;  %v550_v62 = vmax.f32 %v544_v58, 0.0  ;;  %v2014_v51 = vpack.c.bf16 %v1610_v50, %v1609_v49 }
 0x1cc   : > { %v549_v61 = vmax.f32 %v539_v60, 0.0  ;;  %1989 = vmatpush3.bf16.msra.mxu0 %v1986_v5  ;;  %v1624_v5 = vld [vmem:[%s2546_s1 + $0x58] sm:$0xff] }
 0x1cd   : > { %1991 = vmatprep.subr.bf16.mxu0 %v1990_v7  ;;  %v2022_v6 = vpack.c.bf16 %v1624_v5, %v1623_v4 }
 0x1ce   : > { %1819 = vmatprep.mubr.msk.f32.mxu0 %vm449_vm1, %v549_v61 }
 0x1cf   : > { %1820 = vmatmul.mubr.msk.f32.gmra.mrb[6].mxu0 %vm449_vm1, %v550_v62 }
 0x1d0   : > { %1993 = vmatpush3.bf16.msra.mxu0 %v1990_v7  ;;  %v1631_v7 = vld [vmem:[%s2548_s3 + $0x80] sm:$0xff] }
 0x1d1   : > { %1995 = vmatprep.subr.bf16.mxu0 %v1994_v10 }
 0x1d4   : > { %1997 = vmatpush3.bf16.msra.mxu0 %v1994_v10  ;;  %v2026_v10 = vpack.c.bf16 %v1632_v8, %v1631_v7 }
 0x29e   : > { %v1818_v12 = vpop.f32.mrb[4].mxu0 }
 0x29f   : > { %v650_v13 = vadd.f32 %v1818_v12, %v1574_v11  ;;  %v644_v14 = vpop.f32.mrb[5].mxu0 }
 0x2a0   : > { %v645_v19 = vadd.f32 %v1574_v11, %v644_v14  ;;  %v1636_v14 = vld [vmem:[%s2548_s3 + $0xa8] sm:$0xff] }
 0x2a1   : > { %664 = vst.msk [vmem:[%s2314_s14 + $0x8] sm:$0xff] %vm332_vm0, %v650_v13  ;;  %v2324_v22 = vadd.f32 %v650_v13, %v2224_v16  ;;  %v1595_v16 = vld [vmem:[%s2548_s3 + $0x70] sm:$0xff]  ;;  %v1635_v13 = vld [vmem:[%s2548_s3 + $0xa0] sm:$0xff] }
 0x2a2   : > { %663 = vst.msk [vmem:[%s2314_s14] sm:$0xff] %vm332_vm0, %v645_v19  ;;  %v2321_v20 = vadd.f32 %v645_v19, %v2220_v15  ;;  %v1821_v21 = vpop.f32.mrb[6].mxu0  ;;  %v1998_v28 = vpack.c.bf16 %v1596_v27, %v1595_v16  ;;  %v2034_v19 = vpack.c.bf16 %v1636_v14, %v1635_v13 }
 0x2a3   : > { %v660_v23 = vadd.f32 %v1821_v21, %v1574_v11  ;;  %v654_v24 = vpop.f32.mrb[7].mxu0  ;;  %v1612_v21 = vld [vmem:[%s2551_s6 + $0x1] ss:$0 sm:$0xff] }
 0x2a4   : > { %v655_v25 = vadd.f32 %v1574_v11, %v654_v24  ;;  %1830 = vmatprep.mubr.msk.f32.mxu1 %vm332_vm0, %v2321_v20  ;;  %1999 = vmatprep.subr.bf16.mxu0 %v1998_v28  ;;  %v1634_v11 = vld [vmem:[%s2548_s3 + $0x98] sm:$0xff] }
 0x2a5   : > { %666 = vst.msk [vmem:[%s2314_s14 + $0x18] sm:$0xff] %vm332_vm0, %v660_v23  ;;  %1831 = vmatmul.mubr.msk.f32.vlgmr.msra.gmra.mrb[4].mxu1 %vm332_vm0, %v2324_v22  ;;  %v2338_v26 = vadd.f32 %v660_v23, %v2232_v18  ;;  %2001 = vmatpush3.bf16.msra.mxu0 %v1998_v28  ;;  %v1604_v18 = vld [vmem:[%s2550_s5 + $0x48] sm:$0xff]  ;;  %v2030_v12 = vpack.c.bf16 %v1634_v11, %v1633_v9 }
 0x2a6   : > { %665 = vst.msk [vmem:[%s2314_s14 + $0x10] sm:$0xff] %vm332_vm0, %v655_v25  ;;  %v2335_v15 = vadd.f32 %v655_v25, %v2226_v17  ;;  %v1603_v17 = vld [vmem:[%s2550_s5 + $0x40] sm:$0xff]  ;;  %2019 = vmatprep.subr.bf16.mxu0 %v2018_v54 }
 0x2a7   : > { %v2002_v30 = vpack.c.bf16 %v1604_v18, %v1603_v17 }
 0x2a8   : > { %1833 = vmatprep.mubr.msk.f32.mxu1 %vm332_vm0, %v2335_v15 }
 0x2a9   : > { %1834 = vmatmul.mubr.msk.f32.gmra.mrb[6].mxu1 %vm332_vm0, %v2338_v26  ;;  %2003 = vmatprep.subr.bf16.mxu1 %v2002_v30 }
 0x2aa   : > { %2005 = vmatpush3.bf16.msra.mxu1 %v2002_v30 }
 0x2ab   : > { %2007 = vmatprep.subr.bf16.mxu1 %v2006_v32 }
 0x2ae   : > { %2009 = vmatpush3.bf16.msra.mxu1 %v2006_v32  ;;  %v1638_v32 = vld [vmem:[%s2548_s3 + $0xb8] sm:$0xff] }
 0x2af   : > { %2011 = vmatprep.subr.bf16.mxu1 %v2010_v35 }
 0x2b2   : > { %2013 = vmatpush3.bf16.msra.mxu1 %v2010_v35 }
 0x2b3   : > { %2015 = vmatprep.subr.bf16.mxu1 %v2014_v51 }
 0x2b6   : > { %2017 = vmatpush3.bf16.msra.mxu1 %v2014_v51 }
 0x2b7   : > { %2027 = vmatprep.subr.bf16.mxu1 %v2026_v10 }
 0x378   : > { %v1832_v37 = vpop.f32.mrb[4].mxu1 }
 0x379   : > { %v768_v38 = vadd.f32 %v1832_v37, %v1584_v36  ;;  %v762_v39 = vpop.f32.mrb[5].mxu1 }
 0x37a   : > { %v763_v40 = vadd.f32 %v1584_v36, %v762_v39  ;;  %v1650_v39 = vld [vmem:[%s2550_s5 + $0xa8] sm:$0xff] }
 0x37b   : > { %v782_v43 = vmax.f32 %v768_v38, 0.0  ;;  %v1649_v38 = vld [vmem:[%s2550_s5 + $0xa0] sm:$0xff] }
 0x37c   : > { %v781_v41 = vmax.f32 %v763_v40, 0.0  ;;  %v1835_v42 = vpop.f32.mrb[6].mxu1  ;;  %v2050_v40 = vpack.c.bf16 %v1650_v39, %v1649_v38 }
 0x37d   : > { %v778_v44 = vadd.f32 %v1835_v42, %v1584_v36  ;;  %v772_v45 = vpop.f32.mrb[7].mxu1 }
 0x37e   : > { %v773_v46 = vadd.f32 %v1584_v36, %v772_v45  ;;  %1852 = vmatprep.mubr.msk.f32.mxu0 %vm449_vm1, %v781_v41  ;;  %v1648_v36 = vld [vmem:[%s2550_s5 + $0x98] sm:$0xff]  ;;  %v1626_v41 = vld [vmem:[%s2547_s2 + $0x2] ss:$0 sm:$0xff] }
 0x37f   : > { %1853 = vmatmul.mubr.msk.f32.vlgmr.msra.gmra.mrb[8].mxu0 %vm449_vm1, %v782_v43  ;;  %v784_v48 = vmax.f32 %v778_v44, 0.0  ;;  %v2046_v37 = vpack.c.bf16 %v1648_v36, %v1647_v34 }
 0x380   : > { %v783_v47 = vmax.f32 %v773_v46, 0.0  ;;  %2021 = vmatpush3.bf16.msra.mxu0 %v2018_v54  ;;  %v1651_v54 = vld [vmem:[%s2550_s5 + $0xb0] sm:$0xff] }
 0x381   : > { %2023 = vmatprep.subr.bf16.mxu0 %v2022_v6 }
 0x382   : > { %1855 = vmatprep.mubr.msk.f32.mxu0 %vm449_vm1, %v783_v47 }
 0x383   : > { %1856 = vmatmul.mubr.msk.f32.gmra.mrb[10].mxu0 %vm449_vm1, %v784_v48 }
 0x384   : > { %2025 = vmatpush3.bf16.msra.mxu0 %v2022_v6  ;;  %v1654_v6 = vld [vmem:[%s2551_s6 + $0x2] ss:$0 sm:$0xff] }
 0x452   : > { %v1854_v56 = vpop.f32.mrb[8].mxu0 }
 0x453   : > { %v886_v57 = vadd.f32 %v1854_v56, %v1598_v55  ;;  %v880_v58 = vpop.f32.mrb[9].mxu0 }
 0x454   : > { %v881_v59 = vadd.f32 %v1598_v55, %v880_v58 }
 0x455   : > { %v900_v62 = vmax.f32 %v886_v57, 0.0  ;;  %v1640_v57 = vld [vmem:[%s2549_s4 + $0x2] ss:$0 sm:$0xff] }
 0x456   : > { %v899_v60 = vmax.f32 %v881_v59, 0.0  ;;  %v1857_v61 = vpop.f32.mrb[10].mxu0 }
 0x457   : > { %v896_v63 = vadd.f32 %v1857_v61, %v1598_v55  ;;  %v890_v0 = vpop.f32.mrb[11].mxu0 }
 0x458   : > { %v891_v1 = vadd.f32 %v1598_v55, %v890_v0  ;;  %1874 = vmatprep.mubr.msk.f32.mxu1 %vm449_vm1, %v899_v60  ;;  %v1652_v55 = vld [vmem:[%s2550_s5 + $0xb8] sm:$0xff] }
 0x459   : > { %1875 = vmatmul.mubr.msk.f32.vlgmr.msra.gmra.mrb[8].mxu1 %vm449_vm1, %v900_v62  ;;  %v902_v3 = vmax.f32 %v896_v63, 0.0  ;;  %v2054_v56 = vpack.c.bf16 %v1652_v55, %v1651_v54 }
 0x45a   : > { %v901_v2 = vmax.f32 %v891_v1, 0.0  ;;  %2029 = vmatpush3.bf16.msra.mxu1 %v2026_v10 }
 0x45b   : > { %2031 = vmatprep.subr.bf16.mxu1 %v2030_v12 }
 0x45c   : > { %1877 = vmatprep.mubr.msk.f32.mxu1 %vm449_vm1, %v901_v2 }
 0x45d   : > { %1878 = vmatmul.mubr.msk.f32.gmra.mrb[10].mxu1 %vm449_vm1, %v902_v3 }
 0x45e   : > { %2033 = vmatpush3.bf16.msra.mxu1 %v2030_v12 }
 0x45f   : > { %2035 = vmatprep.subr.bf16.mxu1 %v2034_v19 }
 0x462   : > { %2037 = vmatpush3.bf16.msra.mxu1 %v2034_v19 }
 0x52c   : > { %v1876_v23 = vpop.f32.mrb[8].mxu1 }
 0x52d   : > { %v1004_v24 = vadd.f32 %v1876_v23, %v1612_v21  ;;  %v998_v25 = vpop.f32.mrb[9].mxu1 }
 0x52e   : > { %v999_v16 = vadd.f32 %v1612_v21, %v998_v25  ;;  %v1453_v25 = vld [vmem:[%s2314_s14] sm:$0xff] (%p2177_p4) }
 0x52f   : > { %1618 = vst.msk [vmem:[%s2314_s14 + $0x28] sm:$0xff] %vm332_vm0, %v1004_v24  ;;  %v2429_v17 = vadd.f32 %v1004_v24, %v2324_v22  ;;  %v1637_v22 = vld [vmem:[%s2548_s3 + $0xb0] sm:$0xff]  ;;  %1454 = vst [vmem:[%s1403_s22] sm:$0xff] (%p2177_p4), %v1453_v25 }
 0x530   : > { %1617 = vst.msk [vmem:[%s2314_s14 + $0x20] sm:$0xff] %vm332_vm0, %v999_v16  ;;  %v2426_v27 = vadd.f32 %v999_v16, %v2321_v20  ;;  %v1879_v28 = vpop.f32.mrb[10].mxu1  ;;  %v2038_v33 = vpack.c.bf16 %v1638_v32, %v1637_v22  ;;  %v1455_v16 = vld [vmem:[%s2314_s14 + $0x8] sm:$0xff] (%p2177_p4) }
 0x531   : > { %v1014_v18 = vadd.f32 %v1879_v28, %v1612_v21  ;;  %v1008_v29 = vpop.f32.mrb[11].mxu1  ;;  %v1459_v28 = vld [vmem:[%s2314_s14 + $0x18] sm:$0xff] (%p2177_p4)  ;;  %1456 = vst [vmem:[%s1403_s22 + $0x8] sm:$0xff] (%p2177_p4), %v1455_v16 }
 0x532   : > { %v1009_v30 = vadd.f32 %v1612_v21, %v1008_v29  ;;  %1888 = vmatprep.mubr.msk.f32.mxu0 %vm332_vm0, %v2426_v27  ;;  %2039 = vmatprep.subr.bf16.mxu1 %v2038_v33  ;;  %1460 = vst [vmem:[%s1403_s22 + $0x18] sm:$0xff] (%p2177_p4), %v1459_v28 }
 0x533   : > { %1620 = vst.msk [vmem:[%s2314_s14 + $0x38] sm:$0xff] %vm332_vm0, %v1014_v18  ;;  %1889 = vmatmul.mubr.msk.f32.vlgmr.msra.gmra.mrb[12].mxu0 %vm332_vm0, %v2429_v17  ;;  %v2443_v31 = vadd.f32 %v1014_v18, %v2338_v26  ;;  %2041 = vmatpush3.bf16.msra.mxu1 %v2038_v33  ;;  %v1646_v26 = vld [vmem:[%s2550_s5 + $0x88] sm:$0xff] }
 0x534   : > { %1619 = vst.msk [vmem:[%s2314_s14 + $0x30] sm:$0xff] %vm332_vm0, %v1009_v30  ;;  %v2440_v20 = vadd.f32 %v1009_v30, %v2335_v15  ;;  %v1645_v15 = vld [vmem:[%s2550_s5 + $0x80] sm:$0xff] }
 0x535   : > { %v2042_v35 = vpack.c.bf16 %v1646_v26, %v1645_v15 }
 0x536   : > { %1891 = vmatprep.mubr.msk.f32.mxu0 %vm332_vm0, %v2440_v20  ;;  %v1463_v18 = vld [vmem:[%s2314_s14 + $0x28] sm:$0xff] (%p2177_p4) }
 0x537   : > { %1892 = vmatmul.mubr.msk.f32.gmra.mrb[14].mxu0 %vm332_vm0, %v2443_v31  ;;  %2043 = vmatprep.subr.bf16.mxu0 %v2042_v35  ;;  %1464 = vst [vmem:[%s1403_s22 + $0x48] sm:$0xff] (%p2177_p4), %v1463_v18 }
 0x538   : > { %2045 = vmatpush3.bf16.msra.mxu0 %v2042_v35 }
 0x539   : > { %2047 = vmatprep.subr.bf16.mxu0 %v2046_v37 }
 0x53a   : > { %v1467_v30 = vld [vmem:[%s2314_s14 + $0x38] sm:$0xff] (%p2177_p4) }
 0x53b   : > { %v1465_v29 = vld [vmem:[%s2314_s14 + $0x30] sm:$0xff] (%p2177_p4)  ;;  %1468 = vst [vmem:[%s1403_s22 + $0x58] sm:$0xff] (%p2177_p4), %v1467_v30 }
 0x53c   : > { %2049 = vmatpush3.bf16.msra.mxu0 %v2046_v37  ;;  %1466 = vst [vmem:[%s1403_s22 + $0x50] sm:$0xff] (%p2177_p4), %v1465_v29 }
 0x53d   : > { %2051 = vmatprep.subr.bf16.mxu0 %v2050_v40 }
 0x540   : > { %2053 = vmatpush3.bf16.msra.mxu0 %v2050_v40 }
 0x541   : > { %2055 = vmatprep.subr.bf16.mxu0 %v2054_v56 }
 0x544   : > { %2057 = vmatpush3.bf16.msra.mxu0 %v2054_v56 }
 0x606   : > { %v1890_v42 = vpop.f32.mrb[12].mxu0 }
 0x607   : > { %v1123_v43 = vadd.f32 %v1890_v42, %v1626_v41  ;;  %v1117_v44 = vpop.f32.mrb[13].mxu0 }
 0x608   : > { %v1118_v45 = vadd.f32 %v1626_v41, %v1117_v44 }
 0x609   : > { %v1137_v48 = vmax.f32 %v1123_v43, 0.0 }
 0x60a   : > { %v1136_v46 = vmax.f32 %v1118_v45, 0.0  ;;  %v1893_v47 = vpop.f32.mrb[14].mxu0 }
 0x60b   : > { %v1133_v49 = vadd.f32 %v1893_v47, %v1626_v41  ;;  %v1127_v50 = vpop.f32.mrb[15].mxu0 }
 0x60c   : > { %v1128_v51 = vadd.f32 %v1626_v41, %v1127_v50  ;;  %1910 = vmatprep.mubr.msk.f32.mxu1 %vm449_vm1, %v1136_v46 }
 0x60d   : > { %1911 = vmatmul.mubr.msk.f32.vlgmr.msra.gmra.mrb[12].mxu1 %vm449_vm1, %v1137_v48  ;;  %v1139_v53 = vmax.f32 %v1133_v49, 0.0 }
 0x60e   : > { %v1138_v52 = vmax.f32 %v1128_v51, 0.0 }
 0x610   : > { %1913 = vmatprep.mubr.msk.f32.mxu1 %vm449_vm1, %v1138_v52 }
 0x611   : > { %1914 = vmatmul.mubr.msk.f32.gmra.mrb[14].mxu1 %vm449_vm1, %v1139_v53 }
 0x6e0   : > { %v1912_v58 = vpop.f32.mrb[12].mxu1 }
 0x6e1   : > { %v1241_v59 = vadd.f32 %v1912_v58, %v1640_v57  ;;  %v1235_v60 = vpop.f32.mrb[13].mxu1 }
 0x6e2   : > { %v1236_v61 = vadd.f32 %v1640_v57, %v1235_v60 }
 0x6e3   : > { %v1255_v0 = vmax.f32 %v1241_v59, 0.0 }
 0x6e4   : > { %v1254_v62 = vmax.f32 %v1236_v61, 0.0  ;;  %v1915_v63 = vpop.f32.mrb[14].mxu1 }
 0x6e5   : > { %v1251_v1 = vadd.f32 %v1915_v63, %v1640_v57  ;;  %v1245_v2 = vpop.f32.mrb[15].mxu1 }
 0x6e6   : > { %v1246_v3 = vadd.f32 %v1640_v57, %v1245_v2  ;;  %1932 = vmatprep.mubr.msk.f32.mxu0 %vm449_vm1, %v1254_v62 }
 0x6e7   : > { %1933 = vmatmul.mubr.msk.f32.vlgmr.msra.gmra.mrb[16].mxu0 %vm449_vm1, %v1255_v0  ;;  %v1257_v5 = vmax.f32 %v1251_v1, 0.0 }
 0x6e8   : > { %v1256_v4 = vmax.f32 %v1246_v3, 0.0 }
 0x6ea   : > { %1935 = vmatprep.mubr.msk.f32.mxu0 %vm449_vm1, %v1256_v4 }
 0x6eb   : > { %1936 = vmatmul.mubr.msk.f32.gmra.mrb[18].mxu0 %vm449_vm1, %v1257_v5 }
 0x7ba   : > { %v1934_v7 = vpop.f32.mrb[16].mxu0 }
 0x7bb   : > { %v1359_v8 = vadd.f32 %v1934_v7, %v1654_v6  ;;  %v1353_v9 = vpop.f32.mrb[17].mxu0 }
 0x7bc   : > { %v1354_v10 = vadd.f32 %v1654_v6, %v1353_v9 }
 0x7bd   : > { %1660 = vst.msk [vmem:[%s2314_s14 + $0x48] sm:$0xff] %vm332_vm0, %v1359_v8  ;;  %v1378_v13 = vadd.f32 %v1359_v8, %v2429_v17  ;;  %v1461_v17 = vld [vmem:[%s2314_s14 + $0x20] sm:$0xff] (%p2177_p4) }
 0x7be   : > { %1659 = vst.msk [vmem:[%s2314_s14 + $0x40] sm:$0xff] %vm332_vm0, %v1354_v10  ;;  %v1377_v11 = vadd.f32 %v1354_v10, %v2426_v27  ;;  %v1937_v12 = vpop.f32.mrb[18].mxu0  ;;  %1400 = sbr.rel (!%p2177_p4) target bundleno = 1995 (0x7cb), region = 56  ;;  %v1457_v27 = vld [vmem:[%s2314_s14 + $0x10] sm:$0xff] (%p2177_p4)  ;;  %1462 = vst [vmem:[%s1403_s22 + $0x40] sm:$0xff] (%p2177_p4), %v1461_v17 }
 0x7bf   : > { %v1369_v14 = vadd.f32 %v1937_v12, %v1654_v6  ;;  %v1363_v19 = vpop.f32.mrb[19].mxu0  ;;  %1382 = vst.msk [vmem:[%s314_s18 + $0x8] sm:$0xff] %vm332_vm0, %v1378_v13  ;;  %1458 = vst [vmem:[%s1403_s22 + $0x10] sm:$0xff] (%p2177_p4), %v1457_v27 }
 0x7c0   : > { %1381 = vst.msk [vmem:[%s314_s18] sm:$0xff] %vm332_vm0, %v1377_v11  ;;  %v1364_v21 = vadd.f32 %v1654_v6, %v1363_v19 }
 0x7c1   : > { %1662 = vst.msk [vmem:[%s2314_s14 + $0x58] sm:$0xff] %vm332_vm0, %v1369_v14  ;;  %v1380_v24 = vadd.f32 %v1369_v14, %v2443_v31 }
 0x7c2   : > { %1661 = vst.msk [vmem:[%s2314_s14 + $0x50] sm:$0xff] %vm332_vm0, %v1364_v21  ;;  %v1379_v23 = vadd.f32 %v1364_v21, %v2440_v20 }
 0x7c3   : > { %1384 = vst.msk [vmem:[%s314_s18 + $0x18] sm:$0xff] %vm332_vm0, %v1380_v24 }
 0x7c4   : > { %1383 = vst.msk [vmem:[%s314_s18 + $0x10] sm:$0xff] %vm332_vm0, %v1379_v23  ;;  %v1471_v31 = vld [vmem:[%s2314_s14 + $0x48] sm:$0xff] (%p2177_p4) }
 0x7c5   : > { %v1469_v20 = vld [vmem:[%s2314_s14 + $0x40] sm:$0xff]  ;;  %1472 = vst [vmem:[%s1403_s22 + $0x88] sm:$0xff] %v1471_v31 }
 0x7c6   : > { %1470 = vst [vmem:[%s1403_s22 + $0x80] sm:$0xff] %v1469_v20 }
 0x7c8   : > { %v1475_v32 = vld [vmem:[%s2314_s14 + $0x58] sm:$0xff] }
 0x7c9   : > { %v1473_v22 = vld [vmem:[%s2314_s14 + $0x50] sm:$0xff]  ;;  %1476 = vst [vmem:[%s1403_s22 + $0x98] sm:$0xff] %v1475_v32 }
 0x7ca   : > { %1474 = vst [vmem:[%s1403_s22 + $0x90] sm:$0xff] %v1473_v22 }
 0x7cb PF: > { %p16_p8 = scmp.ge.s32.totalorder %s2167_s9, 4   ;;  %s2555_s27 = smov %s2101_s28 }
 0x7cc   : > { %s2556_s28 = smov %s2175_s12  ;;  %s2557_s29 = smov %s2167_s9 }
 0x7cd   :  { %18 = sbr.rel (!%p16_p8) target bundleno = 2 (0x2), region = 142 }

</bundles_post_ra>
